<compile_context>
chip_gen: v6e
topology: v6e:2x2x1
jax: 0.10.0
libtpu: 0.0.40
codegen_flags: <defaults>
</compile_context>

<pallas_src>
import math

import jax
import jax.numpy as jnp
from jax import lax
from jax.experimental import pallas as pl
from jax.experimental.pallas import tpu as pltpu


# ---------------------------------------------------------------------------
# Kernel
# ---------------------------------------------------------------------------
def _distmult_kernel(zc_ref, rel_ref, zo_ref, zneg_ref, pos_ref, neg_ref):
    # zc_ref : (P, D) f32  side that gets multiplied by the relation embedding
    # rel_ref: (P, D) f32  gathered (inv_)rel_emb[edge_type] rows
    # zo_ref : (P, D) f32  the other side
    # zneg_ref: (N, D)     negatives tile for this (chunk, n) (bf16 fast path)
    a = zc_ref[...] * rel_ref[...]                                     # (P, D)

    # Positive scores: f32 row-dot (VPU multiply + XLU reduce), full precision.
    pos_ref[...] = jnp.sum(a * zo_ref[...], axis=-1,
                           keepdims=True).astype(pos_ref.dtype)        # (P, 1)

    # Negative scores: contract over the embedding dim on the MXU.  Operands
    # are cast to the negatives' dtype (bf16 fast path -> native MXU rate)
    # with f32 accumulation; contracting on the last axis of both operands
    # avoids materializing zneg.T (no XLU transpose).
    neg = lax.dot_general(
        a.astype(zneg_ref.dtype), zneg_ref[...],
        dimension_numbers=(((1,), (1,)), ((), ())),
        preferred_element_type=jnp.float32)                            # (P, N)
    neg_ref[...] = neg.astype(neg_ref.dtype)


# ---------------------------------------------------------------------------
# Generation-aware tiling helpers
# ---------------------------------------------------------------------------
def _round_up(x, m):
    return ((x + m - 1) // m) * m


def _vmem_budget_and_caps():
    """Scoped-VMEM budget + default row-tile cap for this TPU generation."""
    try:
        vmem_cap = int(pltpu.get_tpu_info().vmem_capacity_bytes)
    except Exception:
        vmem_cap = 64 * 1024 * 1024            # conservative (v7x-sized)
    if vmem_cap >= 96 * 1024 * 1024:           # v5e / v6e: 128 MiB physical
        return 100 * 1024 * 1024, 512
    return 48 * 1024 * 1024, 256               # v7x: 64 MiB physical


def _select_tiles(num_per_chunk, num_neg_eff, dim, neg_bytes, out_bytes,
                  budget_bytes, p_cap, n_cap):
    """Pick (p_tile, n_tile) so the double-buffered working set fits VMEM."""
    def step_bytes(p, n):
        return 2 * (3 * p * dim * 4            # z_c, rel, z_o row tiles (f32)
                    + n * dim * neg_bytes      # negatives tile
                    + p * 4                    # pos column
                    + p * n * out_bytes)       # neg output tile

    # N can only be tiled when the (possibly padded) width is lane aligned.
    can_tile_n = (num_neg_eff % 128 == 0) and num_neg_eff > 128

    p = num_per_chunk if num_per_chunk <= p_cap else max(8, (p_cap // 8) * 8)
    n = num_neg_eff
    if n_cap is not None and can_tile_n and n_cap < n:
        n = max(128, (n_cap // 128) * 128)

    target = int(budget_bytes * 0.85)
    while step_bytes(p, n) > target:
        if can_tile_n and n > 512:
            n = max(512, _round_up(n // 2, 128))
        elif p > 128:
            p = max(128, _round_up(p // 2, 128))
        elif p > 8:
            p = max(8, _round_up(p // 2, 8))
        else:
            break   # smallest tiles reached; let the compiler handle the rest
    return p, n


# ---------------------------------------------------------------------------
# Forward wrapper
# ---------------------------------------------------------------------------
def distmult_decoder_forward(z_src, z_dst, edge_type, z_neg, corruption,
                             rel_emb, inv_rel_emb, *,
                             use_bf16_mxu=True,
                             neg_out_dtype=None,
                             p_tile_cap=None, n_tile_cap=None):
    num_pos, dim = z_src.shape
    num_chunks, num_neg, _ = z_neg.shape
    num_per_chunk = math.ceil(num_pos / num_chunks)
    new_size = num_per_chunk * num_chunks
    pad_rows = new_size - num_pos

    if neg_out_dtype is None:
        # Keep the module's output dtype; pass jnp.bfloat16 here to halve the
        # writeback traffic of the dominant (new_size, num_neg) slab.
        neg_out_dtype = z_src.dtype

    if corruption == 'src':
        z_c, z_o = z_dst, z_src          # z_c gets multiplied + used for neg bmm
        rel = inv_rel_emb[edge_type]
    else:
        z_c, z_o = z_src, z_dst
        rel = rel_emb[edge_type]
    # TODO(synk): fold the rel_emb[edge_type] gather into the kernel (resident
    # table + per-tile int32 edge_type block) when num_relations*dim is small.

    if pad_rows > 0:
        # Padded rows are zero -> their pos/neg scores are exactly 0, matching
        # torch.nn.functional.pad semantics in the reference module.
        # TODO(synk): guarantee num_pos % num_chunks == 0 upstream (or fold the
        # chunk offset into the row index_map) to avoid these full-array copies.
        z_c = jnp.pad(z_c, ((0, pad_rows), (0, 0)))
        z_o = jnp.pad(z_o, ((0, pad_rows), (0, 0)))
        rel = jnp.pad(rel, ((0, pad_rows), (0, 0)))

    z_c = z_c.reshape(num_chunks, num_per_chunk, dim)
    z_o = z_o.reshape(num_chunks, num_per_chunk, dim)
    rel = rel.reshape(num_chunks, num_per_chunk, dim)

    # bf16 negatives feed the MXU's native path and halve the resident
    # negatives block in VMEM/DMA. Accumulation stays f32 inside the kernel.
    neg_in_dtype = jnp.bfloat16 if use_bf16_mxu else z_neg.dtype
    z_neg_k = z_neg.astype(neg_in_dtype)

    # Lane padding of num_neg is gated: only pad to a multiple of 128 when the
    # overhead is small; otherwise keep the true width (full-extent blocks,
    # masked stores) so small num_neg is not inflated.
    num_neg_128 = _round_up(num_neg, 128)
    if num_neg_128 != num_neg and (num_neg_128 - num_neg) <= 0.25 * num_neg:
        num_neg_eff = num_neg_128
        z_neg_k = jnp.pad(z_neg_k, ((0, 0), (0, num_neg_eff - num_neg), (0, 0)))
    else:
        num_neg_eff = num_neg

    budget_bytes, p_cap_default = _vmem_budget_and_caps()
    p_cap = p_tile_cap if p_tile_cap is not None else p_cap_default
    neg_bytes = jnp.dtype(neg_in_dtype).itemsize
    out_bytes = jnp.dtype(neg_out_dtype).itemsize
    p_tile, n_tile = _select_tiles(num_per_chunk, num_neg_eff, dim,
                                   neg_bytes, out_bytes, budget_bytes,
                                   p_cap, n_tile_cap)
    num_row_tiles = pl.cdiv(num_per_chunk, p_tile)
    num_n_tiles = pl.cdiv(num_neg_eff, n_tile)

    # Grid: chunks (outer), N tiles, row tiles (inner).  The negatives tile is
    # resident across the inner row-tile loop; partial row/N tiles rely only on
    # Pallas output masking (row-/column-wise computation, so garbage OOB input
    # rows never reach a stored output element).
    grid = (num_chunks, num_n_tiles, num_row_tiles)
    if num_chunks >= 2:
        # v7x megacore shards the chunk axis so each TensorCore's negatives
        # block stays private and resident. The row/N axes revisit the pos
        # output block, so they must stay "arbitrary".
        semantics = ("parallel", "arbitrary", "arbitrary")
    else:
        semantics = ("arbitrary", "arbitrary", "arbitrary")

    pos, neg = pl.pallas_call(
        _distmult_kernel,
        out_shape=(
            jax.ShapeDtypeStruct((num_chunks, num_per_chunk, 1), jnp.float32),
            jax.ShapeDtypeStruct((num_chunks, num_per_chunk, num_neg_eff),
                                 neg_out_dtype),
        ),
        grid_spec=pltpu.PrefetchScalarGridSpec(
            num_scalar_prefetch=0,
            grid=grid,
            in_specs=[
                pl.BlockSpec((None, p_tile, dim), lambda c, n, r: (c, r, 0)),
                pl.BlockSpec((None, p_tile, dim), lambda c, n, r: (c, r, 0)),
                pl.BlockSpec((None, p_tile, dim), lambda c, n, r: (c, r, 0)),
                # negatives: resident across the (inner) row-tile axis
                pl.BlockSpec((None, n_tile, dim), lambda c, n, r: (c, n, 0)),
            ],
            out_specs=[
                pl.BlockSpec((None, p_tile, 1), lambda c, n, r: (c, r, 0)),
                pl.BlockSpec((None, p_tile, n_tile),
                             lambda c, n, r: (c, r, n)),
            ],
        ),
        compiler_params=pltpu.CompilerParams(
            dimension_semantics=semantics,
            vmem_limit_bytes=int(budget_bytes)),
    )(z_c, rel, z_o, z_neg_k)

    pos_scores = pos.reshape(new_size)
    neg_scores = neg.reshape(new_size, num_neg_eff)
    if num_neg_eff != num_neg:
        # TODO(synk): let the consumer slice lazily to avoid this extra HBM pass.
        neg_scores = neg_scores[:, :num_neg]
    return pos_scores, neg_scores


# ---------------------------------------------------------------------------
# Pure-JAX reference mirroring the PyTorch module
# ---------------------------------------------------------------------------
def reference_forward(z_src, z_dst, edge_type, z_neg, corruption,
                      rel_emb, inv_rel_emb, *, bf16_matmul=False):
    num_pos, dim = z_src.shape
    num_chunks = z_neg.shape[0]
    num_per_chunk = math.ceil(num_pos / num_chunks)
    if corruption == 'src':
        z_dst = z_dst * inv_rel_emb[edge_type]
    else:
        z_src = z_src * rel_emb[edge_type]
    if num_per_chunk != num_pos / num_chunks:
        new_size = num_per_chunk * num_chunks
        z_src = jnp.pad(z_src, ((0, new_size - num_pos), (0, 0)))
        z_dst = jnp.pad(z_dst, ((0, new_size - num_pos), (0, 0)))
    pos_scores = (z_src * z_dst).sum(-1)
    z = (z_dst if corruption == 'src' else z_src).reshape(
        num_chunks, num_per_chunk, dim)
    zn = z_neg
    if bf16_matmul:
        z = z.astype(jnp.bfloat16)
        zn = zn.astype(jnp.bfloat16)
        neg_scores = jnp.einsum('cpd,cnd->cpn', z, zn,
                                preferred_element_type=jnp.float32)
    else:
        neg_scores = jnp.einsum('cpd,cnd->cpn', z, zn,
                                precision=lax.Precision.HIGHEST,
                                preferred_element_type=jnp.float32)
    return pos_scores, neg_scores.reshape(-1, z_neg.shape[1])


# ---------------------------------------------------------------------------
# Test harness
# ---------------------------------------------------------------------------
def _run_case(key, *, num_relations, dim, num_pos, num_chunks, num_neg,
              p_tile_cap=None, n_tile_cap=None, use_bf16_mxu=True):
    k1, k2, k3, k4, k5, k6 = jax.random.split(key, 6)
    z_src = jax.random.normal(k1, (num_pos, dim), dtype=jnp.float32)
    z_dst = jax.random.normal(k2, (num_pos, dim), dtype=jnp.float32)
    edge_type = jax.random.randint(k3, (num_pos,), 0, num_relations,
                                   dtype=jnp.int32)
    z_neg = jax.random.normal(k4, (num_chunks, num_neg, dim),
                              dtype=jnp.float32)
    # reset_parameters() initializes both tables to ones; perturb slightly so
    # the gather + relation multiply are actually exercised by the test.
    rel_emb = 1.0 + 0.1 * jax.random.normal(k5, (num_relations, dim),
                                            dtype=jnp.float32)
    inv_rel_emb = 1.0 + 0.1 * jax.random.normal(k6, (num_relations, dim),
                                                dtype=jnp.float32)

    ok = True
    for corruption in ('dst', 'src'):
        pos, neg = distmult_decoder_forward(
            z_src, z_dst, edge_type, z_neg, corruption, rel_emb, inv_rel_emb,
            use_bf16_mxu=use_bf16_mxu,
            p_tile_cap=p_tile_cap, n_tile_cap=n_tile_cap)
        pos = jax.block_until_ready(pos)
        neg = jax.block_until_ready(neg)

        pos_f32, neg_f32 = reference_forward(
            z_src, z_dst, edge_type, z_neg, corruption, rel_emb, inv_rel_emb,
            bf16_matmul=False)

        # Positive scores are computed fully in f32 inside the kernel.
        ok &= bool(jnp.allclose(pos, pos_f32, atol=1e-3, rtol=1e-4))

        if use_bf16_mxu:
            # Compare against a reference that uses the same bf16 operands with
            # f32 accumulation (tight check of the kernel math).
            _, neg_bf16 = reference_forward(
                z_src, z_dst, edge_type, z_neg, corruption, rel_emb,
                inv_rel_emb, bf16_matmul=True)
            ok &= bool(jnp.allclose(neg, neg_bf16, atol=1e-2, rtol=1e-2))
        else:
            ok &= bool(jnp.allclose(neg, neg_f32, atol=1e-3, rtol=1e-3))
    return ok


if __name__ == "__main__":
    key = jax.random.PRNGKey(0)
    ka, kb, kc = jax.random.split(key, 3)

    ok = True
    # Case 1: small shapes with a ragged tail and small num_neg (no lane
    # padding thanks to the gate); run both the bf16-MXU and pure-f32 paths.
    ok &= _run_case(ka, num_relations=5, dim=32, num_pos=30, num_chunks=4,
                    num_neg=16, use_bf16_mxu=True)
    ok &= _run_case(ka, num_relations=5, dim=32, num_pos=30, num_chunks=4,
                    num_neg=16, use_bf16_mxu=False)
    # Case 2: multiple row tiles per chunk with a partial last tile and a
    # num_neg whose 128-padding would be too wasteful (kept unpadded).
    ok &= _run_case(kb, num_relations=5, dim=128, num_pos=300, num_chunks=2,
                    num_neg=160, p_tile_cap=64, use_bf16_mxu=True)
    # Case 3: num_neg padded up to 1024 (cheap pad) and tiled along N
    # (exercises the 3rd grid axis, padding, and the post-kernel slice).
    ok &= _run_case(kc, num_relations=7, dim=128, num_pos=256, num_chunks=2,
                    num_neg=1000, n_tile_cap=512, use_bf16_mxu=True)

    if ok:
        print("KERNEL_OK")
    else:
        raise SystemExit("mismatch vs reference")
</pallas_src>

<mosaic_0001>
module attributes {stable_mosaic.version = 11 : i64} {
  func.func @_distmult_kernel(%arg0: i32, %arg1: i32, %arg2: i32, %arg3: memref<1x8x32xf32, #tpu.memory_space<vmem>>, %arg4: memref<1x8x32xf32, #tpu.memory_space<vmem>>, %arg5: memref<1x8x32xf32, #tpu.memory_space<vmem>>, %arg6: memref<1x16x32xbf16, #tpu.memory_space<vmem>>, %arg7: memref<1x8x1xf32, #tpu.memory_space<vmem>>, %arg8: memref<1x8x16xf32, #tpu.memory_space<vmem>>) attributes {dimension_semantics = [#tpu.dimension_semantics<parallel>, #tpu.dimension_semantics<arbitrary>, #tpu.dimension_semantics<arbitrary>], iteration_bounds = array<i64: 4, 1, 1>, scalar_prefetch = 0 : i64, scratch_operands = 0 : i64, tpu.core_type = #tpu.core_type<tc>, window_params = [{transform_indices = @transform_0, window_bounds = array<i64: 1, 8, 32>}, {transform_indices = @transform_1, window_bounds = array<i64: 1, 8, 32>}, {transform_indices = @transform_2, window_bounds = array<i64: 1, 8, 32>}, {transform_indices = @transform_3, window_bounds = array<i64: 1, 16, 32>}, {transform_indices = @transform_4, window_bounds = array<i64: 1, 8, 1>}, {transform_indices = @transform_5, window_bounds = array<i64: 1, 8, 16>}]} {
    %c0 = arith.constant 0 : index
    %c0_0 = arith.constant 0 : index
    %c0_1 = arith.constant 0 : index
    %0 = vector.load %arg3[%c0, %c0_0, %c0_1] : memref<1x8x32xf32, #tpu.memory_space<vmem>>, vector<1x8x32xf32>
    %1 = vector.shape_cast %0 : vector<1x8x32xf32> to vector<8x32xf32>
    %c0_2 = arith.constant 0 : index
    %c0_3 = arith.constant 0 : index
    %c0_4 = arith.constant 0 : index
    %2 = vector.load %arg4[%c0_2, %c0_3, %c0_4] : memref<1x8x32xf32, #tpu.memory_space<vmem>>, vector<1x8x32xf32>
    %3 = vector.shape_cast %2 : vector<1x8x32xf32> to vector<8x32xf32>
    %4 = arith.mulf %1, %3 : vector<8x32xf32>
    %c0_5 = arith.constant 0 : index
    %c0_6 = arith.constant 0 : index
    %c0_7 = arith.constant 0 : index
    %5 = vector.load %arg5[%c0_5, %c0_6, %c0_7] : memref<1x8x32xf32, #tpu.memory_space<vmem>>, vector<1x8x32xf32>
    %6 = vector.shape_cast %5 : vector<1x8x32xf32> to vector<8x32xf32>
    %7 = arith.mulf %4, %6 : vector<8x32xf32>
    %cst = arith.constant dense<0.000000e+00> : vector<8xf32>
    %8 = vector.multi_reduction <add>, %7, %cst [1] : vector<8x32xf32> to vector<8xf32>
    %9 = vector.shape_cast %8 : vector<8xf32> to vector<8x1xf32>
    %c0_8 = arith.constant 0 : index
    %c0_9 = arith.constant 0 : index
    %c0_10 = arith.constant 0 : index
    %10 = vector.load %arg7[%c0_8, %c0_9, %c0_10] : memref<1x8x1xf32, #tpu.memory_space<vmem>>, vector<1x8x1xf32>
    %11 = vector.shape_cast %10 : vector<1x8x1xf32> to vector<8x1xf32>
    %12 = vector.shape_cast %9 : vector<8x1xf32> to vector<1x8x1xf32>
    tpu.vector_store %arg7[%c0_8, %c0_9, %c0_10], %12 {strides = array<i32>} : memref<1x8x1xf32, #tpu.memory_space<vmem>>, vector<1x8x1xf32>,
    %13 = arith.truncf %4 : vector<8x32xf32> to vector<8x32xbf16>
    %c0_11 = arith.constant 0 : index
    %c0_12 = arith.constant 0 : index
    %c0_13 = arith.constant 0 : index
    %14 = vector.load %arg6[%c0_11, %c0_12, %c0_13] : memref<1x16x32xbf16, #tpu.memory_space<vmem>>, vector<1x16x32xbf16>
    %15 = vector.shape_cast %14 : vector<1x16x32xbf16> to vector<16x32xbf16>
    %cst_14 = arith.constant dense<0.000000e+00> : vector<8x16xf32>
    %16 = tpu.matmul %13, %15, %cst_14 {dimension_numbers = #tpu.dot_dimension_numbers<[1], [1], [0], [0], [0, 0, 1, 0], [], []>} : vector<8x32xbf16>, vector<16x32xbf16>, vector<8x16xf32> -> vector<8x16xf32>
    %c0_15 = arith.constant 0 : index
    %c0_16 = arith.constant 0 : index
    %c0_17 = arith.constant 0 : index
    %17 = vector.load %arg8[%c0_15, %c0_16, %c0_17] : memref<1x8x16xf32, #tpu.memory_space<vmem>>, vector<1x8x16xf32>
    %18 = vector.shape_cast %17 : vector<1x8x16xf32> to vector<8x16xf32>
    %19 = vector.shape_cast %16 : vector<8x16xf32> to vector<1x8x16xf32>
    tpu.vector_store %arg8[%c0_15, %c0_16, %c0_17], %19 {strides = array<i32>} : memref<1x8x16xf32, #tpu.memory_space<vmem>>, vector<1x8x16xf32>,
    return
  }
  func.func @transform_0(%arg0: i32, %arg1: i32, %arg2: i32) -> (i32, i32, i32) {
    %c0_i32 = arith.constant 0 : i32
    %c0_i32_0 = arith.constant 0 : i32
    return %arg0, %arg2, %c0_i32 : i32, i32, i32
  }
  func.func @transform_1(%arg0: i32, %arg1: i32, %arg2: i32) -> (i32, i32, i32) {
    %c0_i32 = arith.constant 0 : i32
    %c0_i32_0 = arith.constant 0 : i32
    return %arg0, %arg2, %c0_i32 : i32, i32, i32
  }
  func.func @transform_2(%arg0: i32, %arg1: i32, %arg2: i32) -> (i32, i32, i32) {
    %c0_i32 = arith.constant 0 : i32
    %c0_i32_0 = arith.constant 0 : i32
    return %arg0, %arg2, %c0_i32 : i32, i32, i32
  }
  func.func @transform_3(%arg0: i32, %arg1: i32, %arg2: i32) -> (i32, i32, i32) {
    %c0_i32 = arith.constant 0 : i32
    %c0_i32_0 = arith.constant 0 : i32
    return %arg0, %arg1, %c0_i32 : i32, i32, i32
  }
  func.func @transform_4(%arg0: i32, %arg1: i32, %arg2: i32) -> (i32, i32, i32) {
    %c0_i32 = arith.constant 0 : i32
    %c0_i32_0 = arith.constant 0 : i32
    return %arg0, %arg2, %c0_i32 : i32, i32, i32
  }
  func.func @transform_5(%arg0: i32, %arg1: i32, %arg2: i32) -> (i32, i32, i32) {
    %c0_i32 = arith.constant 0 : i32
    return %arg0, %arg2, %arg1 : i32, i32, i32
  }
}

</mosaic_0001>

<bundles_post_ra>
// kernel: tpu_custom_call.1
= control target key start
LH: loop header
LB: loop body
LE: loop exit
PB: predicated region body
PF: predicated region fallthrough
CT: control target
= control target key end

     0   :  { %s1275_s0 = inlined_call_operand.hbm [shape: f32[4,8,32], index: 0, kind: input, shape index: {}]   ;;  %s1276_s1 = inlined_call_operand.hbm [shape: f32[4,8,32], index: 1, kind: input, shape index: {}]   ;;  %s1277_s2 = inlined_call_operand.hbm [shape: f32[4,8,32], index: 2, kind: input, shape index: {}]   ;;  %s1278_s3 = inlined_call_operand.hbm [shape: bf16[4,16,32], index: 3, kind: input, shape index: {}]   ;;  %s1279_s4 = inlined_call_operand.vmem [shape: f32[4,8,1], index: 4, kind: output, shape index: {0}]   ;;  %s1280_s5 = inlined_call_operand.hbm [shape: f32[4,8,16], index: 5, kind: output, shape index: {1}]  }
   0x1   :  { %1285 = sst [smem:[#allocation20_spill]] %s1276_s1 }
   0x2   :  { %11 = vsyncpa [#allocation3], 0 }
   0x3   :  { %13 = vsyncpa [#allocation3 + $0x1], 0 }
   0x4   :  { %14 = vsyncpa [#allocation6], 0 }
   0x5   :  { %16 = vsyncpa [#allocation6 + $0x1], 0 }
   0x6   :  { %17 = vsyncpa [#allocation9], 0 }
   0x7   :  { %19 = vsyncpa [#allocation9 + $0x1], 0 }
   0x8   :  { %20 = vsyncpa [#allocation4], 0 }
   0x9   :  { %22 = vsyncpa [#allocation4 + $0x1], 0  ;;  %s1045_s18 = smov 0   ;;  %s1047_s19 = smov 0  }
   0xa   :  { %s1049_s20 = smov 0   ;;  %s1051_s21 = smov 0  }
   0xb   :  { %s1053_s22 = smov 0   ;;  %s1055_s23 = smov 0  }
   0xc LB: > { %1286 = sst [smem:[#allocation15_spill]] %s992_s20  ;;  %s1076_s24 = sadd.s32 4294967295, %s1004_s23   ;;  %s1004_s23 = sphi %s1055_s23, %s28_s23   ;;  %s1000_s22 = sphi %s1053_s22, %s1302_s22   ;;  %s996_s21 = sphi %s1051_s21, %s1301_s21   ;;  %s992_s20 = sphi %s1049_s20, %s1300_s20   ;;  %s988_s19 = sphi %s1047_s19, %s1304_s19   ;;  %s984_s18 = sphi %s1045_s18, %s1303_s18  }
   0xd   : > { %1287 = sst [smem:[#allocation16_spill]] %s1000_s22  ;;  %s688_s25 = sadd.s32 4294967294, %s1004_s23  }
   0xe   : > { %s47_s26 = sadd.s32 1, %s1000_s22  ;;  %s56_s27 = sadd.s32 1, %s992_s20 }
   0xf   : > { %p49_p0 = scmp.ge.s32.totalorder %s47_s26, 4  ;;  %p63_p1 = scmp.ne.s32.totalorder %s992_s20, %s988_s19 }
  0x10   : > { %p64_p2 = scmp.eq.s32.totalorder %s1004_s23, 0  ;;  %p69_p3 = scmp.ne.s32.totalorder %s988_s19, %s984_s18 }
  0x11   : > { %s1306_s26 = smov (%p49_p0, %s47_s26), 0  ;;  %p70_p5 = scmp.eq.s32.totalorder %s1076_s24, 0 }
  0x12   : > { %1288 = sst [smem:[#allocation17_spill]] %s1306_s26  ;;  %p1088_p4 = por %p64_p2, %p63_p1 }
  0x13   : > { %s51_s29 = ssub.s32 %s1000_s22, %s1306_s26  ;;  %p209_p6 = scmp.eq.s32.totalorder %s1076_s24, 3 }
  0x14   : > { %p54_p7 = scmp.eq.s32.totalorder %s51_s29, 0  ;;  %p1096_p8 = por %p70_p5, %p69_p3 }
  0x15   : > { %p1100_p9 = por %p209_p6, %p63_p1  ;;  %p215_p10 = scmp.eq.s32.totalorder %s688_s25, 3 }
  0x16   : > { %s1105_s7 = scalar_select %p54_p7, %s992_s20, %s56_s27  }
  0x17   : > { %p1107_p11 = por %p215_p10, %p69_p3  ;;  %p749_p12 = scmp.lt.s32.totalorder %s1004_s23, 4 }
  0x18   : > { %1292 = sst [smem:[#allocation18_spill]] %s1105_s7  ;;  %s1113_s9 = sand.u32 1, %s992_s20  }
  0x19   : > { %s1293_s8 = scalar_select %p1107_p11, 1, 0 }
  0x1a   : > { %s1116_s10 = sshll.u32 %s1113_s9, 3  ;;  %s1119_s11 = sshll.u32 %s1000_s22, 7 }
  0x1b   : > { %1294 = sst [smem:[#allocation19_spill]] %s1293_s8  ;;  %p1123_p13 = pnand %p749_p12, %p1088_p4 }
  0x1c   : > { %s254_s13 = sand.u32 1, %s1004_s23   ;;  %s1296_s1 = sld [smem:[#allocation20_spill]] }
  0x1d   : > { %s258_s17 = scalar_lea.vmem [#allocation5], %s1116_s10  ;;  %p700_p0 = scmp.ge.s32.totalorder %s1004_s23, 1 }
  0x1e   : > { %s266_s25 = sshll.u32 %s258_s17, 4  ;;  %p313_p1 = scmp.lt.s32.totalorder %s1004_s23, 5  ;;  %s267_s25 = int_to_ptr.vmem [resolvable:$true] %s266_s25 }
  0x1f   : > { %s1135_s27 = scalar_lea.sflag [#allocation6], %s254_s13  ;;  %p806_p2 = pneg %p1123_p13 }
  0x20   : > { %s817_s28 = scalar_lea.vmem %s267_s25, 128  ;;  %s1006_s29 = smov [#allocation5]  }
  0x21   : > { %p818_p3 = scmp.ne.s32.totalorder %s267_s25, %s817_s28  ;;  %s822_s26 = sshll.u32 %s1006_s29, 4  ;;  %s823_s26 = int_to_ptr.vmem [resolvable:$false] %s822_s26 }
  0x22   : > { %s264_s16 = scalar_lea.hbm %s1296_s1, %s1119_s11  ;;  %s824_s14 = scalar_lea.vmem %s823_s26, 256 }
  0x23   : > { %p820_p4 = pnand %p818_p3, %p806_p2  ;;  %p825_p6 = scmp.lt.s32.totalorder %s267_s25, %s823_s26 }
  0x24   : > { %p826_p7 = scmp.lt.s32.totalorder %s824_s14, %s817_s28 }
  0x25   : > { %p821_p5 = pneg %p820_p4 }
  0x26   : > { %p827_p10 = por %p826_p7, %p825_p6 }
  0x28   : > { %p828_p12 = pnand %p827_p10, %p821_p5 }
  0x2a   : > { %831 = shalt.err (!%p828_p12)
}
  0x2b   : > { %738 = dma.hbm_to_vmem [thread:$0]  (!%p1123_p13), %s264_s16, 128, %s267_s25, %s1135_s27  }
  0x2c   : > { %p1149_p3 = pnand %p700_p0, %p313_p1  ;;  %s245_s17 = scalar_lea.hbm %s1275_s0, %s1119_s11 }
  0x2d   : > { %s239_s28 = scalar_lea.vmem [#allocation2], %s1116_s10  ;;  %s283_s22 = scalar_lea.hbm %s1277_s2, %s1119_s11 }
  0x2e   : > { %s247_s29 = sshll.u32 %s239_s28, 4  ;;  %s236_s7 = scalar_lea.sflag [#allocation3], %s1113_s9  ;;  %s248_s29 = int_to_ptr.vmem [resolvable:$true] %s247_s29 }
  0x2f   : > { %s845_s20 = scalar_lea.vmem %s248_s29, 128  ;;  %s1007_s16 = smov [#allocation2]  }
  0x30   : > { %p846_p4 = scmp.ne.s32.totalorder %s248_s29, %s845_s20  ;;  %s850_s25 = sshll.u32 %s1007_s16, 4  ;;  %s851_s25 = int_to_ptr.vmem [resolvable:$false] %s850_s25 }
  0x31   : > { %s852_s8 = scalar_lea.vmem %s851_s25, 256  ;;  %p853_p5 = scmp.lt.s32.totalorder %s248_s29, %s851_s25 }
  0x32   : > { %p848_p0 = pnand %p846_p4, %p806_p2  ;;  %p854_p6 = scmp.lt.s32.totalorder %s852_s8, %s845_s20 }
  0x34   : > { %p849_p1 = pneg %p848_p0  ;;  %p855_p7 = por %p854_p6, %p853_p5 }
  0x36   : > { %p856_p10 = pnand %p855_p7, %p849_p1 }
  0x38   : > { %859 = shalt.err (!%p856_p10)
}
  0x39   : > { %735 = dma.hbm_to_vmem [thread:$0]  (!%p1123_p13), %s245_s17, 128, %s248_s29, %s236_s7  }
  0x3a   : > { %s277_s1 = scalar_lea.vmem [#allocation7], %s1116_s10  ;;  %s1008_s28 = smov [#allocation7]  }
  0x3b   : > { %s285_s26 = sshll.u32 %s277_s1, 4  ;;  %s878_s14 = sshll.u32 %s1008_s28, 4  ;;  %s286_s26 = int_to_ptr.vmem [resolvable:$true] %s285_s26  ;;  %s879_s14 = int_to_ptr.vmem [resolvable:$false] %s878_s14 }
  0x3c   : > { %s873_s15 = scalar_lea.vmem %s286_s26, 128  ;;  %s880_s20 = scalar_lea.vmem %s879_s14, 256 }
  0x3d   : > { %p874_p12 = scmp.ne.s32.totalorder %s286_s26, %s873_s15  ;;  %p881_p1 = scmp.lt.s32.totalorder %s286_s26, %s879_s14 }
  0x3e   : > { %p882_p5 = scmp.lt.s32.totalorder %s880_s20, %s873_s15 }
  0x3f   : > { %p876_p4 = pnand %p874_p12, %p806_p2 }
  0x40   : > { %p883_p6 = por %p882_p5, %p881_p1 }
  0x41   : > { %p877_p0 = pneg %p876_p4 }
  0x43   : > { %p884_p7 = pnand %p883_p6, %p877_p0 }
  0x45   : > { %887 = shalt.err (!%p884_p7)
}
  0x46   : > { %741 = dma.hbm_to_vmem [thread:$0]  (!%p1123_p13), %s283_s22, 128, %s286_s26, %s1135_s27  }
  0x47   : > { %s304_s16 = scalar_lea.hbm %s1278_s3, %s1119_s11  ;;  %s296_s25 = scalar_lea.vmem [#allocation8], %s1116_s10 }
  0x48   : > { %s305_s1 = sshll.u32 %s296_s25, 4  ;;  %s293_s15 = scalar_lea.sflag [#allocation9], %s1113_s9  ;;  %s306_s1 = int_to_ptr.vmem [resolvable:$true] %s305_s1 }
  0x49   : > { %s901_s28 = scalar_lea.vmem %s306_s1, 128  ;;  %s1009_s14 = smov [#allocation8]  }
  0x4a   : > { %p902_p10 = scmp.ne.s32.totalorder %s306_s1, %s901_s28  ;;  %s906_s20 = sshll.u32 %s1009_s14, 4  ;;  %s907_s20 = int_to_ptr.vmem [resolvable:$false] %s906_s20 }
  0x4b   : > { %s908_s7 = scalar_lea.vmem %s907_s20, 256  ;;  %p909_p0 = scmp.lt.s32.totalorder %s306_s1, %s907_s20 }
  0x4c   : > { %p904_p12 = pnand %p902_p10, %p806_p2  ;;  %p910_p1 = scmp.lt.s32.totalorder %s908_s7, %s901_s28 }
  0x4e   : > { %p905_p4 = pneg %p904_p12  ;;  %p911_p5 = por %p910_p1, %p909_p0 }
  0x50   : > { %p912_p6 = pnand %p911_p5, %p905_p4 }
  0x52   : > { %915 = shalt.err (!%p912_p6)
}
  0x53   : > { %s1010_s22 = smov 64   ;;  %s1011_s10 = smov 4  }
  0x54   : > { %744 = dma.hbm_to_vmem [thread:$0]  (!%p1123_p13), %s304_s16, 128, %s306_s1, %s293_s15, %s1010_s22, %s1010_s22, %s1011_s10  }
  0x55   : > { %317 = sbr.rel (%p1149_p3) target bundleno = 315 (0x13b), region = 36  ;;  %s1194_s9 = sand.u32 (!%p1149_p3), 1, %s988_s19  }
  0x56   : > { %s1197_s11 = sshll.u32 (!%p1149_p3), %s1194_s9, 3  ;;  %s320_s27 = scalar_lea.sflag (!%p1149_p3), [#allocation3], %s1194_s9 }
  0x57   : > { %s323_s26 = scalar_lea.vmem (!%p1149_p3), [#allocation2], %s1197_s11 }
  0x5a   : > { %967 = dma.done.wait (%p1096_p8), %s320_s27, 128  }
  0x5b   : > { %969 = vsyncadd (%p1096_p8), %s320_s27, 4294967168  ;;  %s328_s12 = sand.u32 1, %s1076_s24   ;;  %s332_s8 = scalar_lea.vmem [#allocation5], %s1197_s11 }
  0x5c   : > { %s329_s13 = scalar_lea.sflag [#allocation6], %s328_s12 }
  0x5d   : > { %971 = dma.done.wait (%p1096_p8), %s329_s13, 256  }
  0x5e   : > { %973 = vsyncadd (%p1096_p8), %s329_s13, 4294967040  ;;  %s341_s17 = scalar_lea.vmem [#allocation7], %s1197_s11  ;;  %s347_s29 = scalar_lea.sflag [#allocation9], %s1194_s9 }
  0x5f   : > { %s350_s16 = scalar_lea.vmem [#allocation8], %s1197_s11 }
  0x60   : > { %975 = dma.done.wait (%p1096_p8), %s347_s29, 128  }
  0x61   : > { %977 = vsyncadd (%p1096_p8), %s347_s29, 4294967168  ;;  %v1012_v0 = vmov 0.0   ;;  %vm1013_vm0 = vmmov 0   ;;  %vm413_vm1 = vcmask 261120   ;;  %v803_v1 = vld [vmem:[%s350_s16] sm:$0xff]   ;;  %v408_v2 = vld [vmem:[%s323_s26] sm:$0xff] }
  0x62   : > { %716 = vmatprep.subr.bf16.mxu0 %v1012_v0  ;;  %718 = vmatprep.mubr.msk.bf16.mxu0 %vm1013_vm0, %v1012_v0  ;;  %v409_v3 = vld [vmem:[%s332_s8] sm:$0xff]  ;;  %v411_v4 = vld [vmem:[%s341_s17] sm:$0xff]  ;;  %v431_v5 = vsel %vm413_vm1, %v803_v1, 0  ;;  %p400_p8 = scmp.lt.s32.totalorder %s996_s21, 3  ;;  %vm417_vm2 = vcmask 7168   ;;  %s710_s28 = sshll.u32 %s996_s21, 7 }
  0x63   : > { %v410_v6 = vmul.f32 %v409_v3, %v408_v2  ;;  %717 = vmatpush3.bf16.xpose.msra.mxu0 %v431_v5  ;;  %s398_s14 = scalar_lea.vmem [#allocation10], %s1197_s11  ;;  %vm473_vm3 = vcmask 130048   ;;  %s1228_s10 = scalar_lea.hbm %s1280_s5, %s710_s28 }
  0x64   : > { %s401_s24 = scalar_select %p400_p8, %s996_s21, 3 }
  0x65   : > { %v412_v7 = vmul.f32 %v411_v4, %v410_v6  ;;  %v419_v8 = vpack.c.bf16 %v410_v6, %v410_v6  ;;  %s501_s20 = sshll.u32 %s398_s14, 4  ;;  %s483_s27 = scalar_lea.sflag [#allocation4], %s1194_s9  ;;  %s1230_s20 = int_to_ptr.vmem [resolvable:$true] %s501_s20 }
  0x66   : > { %s706_s30 = sshll.u32 %s401_s24, 3  ;;  %s916_s26 = scalar_lea.vmem %s1230_s20, 128 }
  0x67   : > { %v414_v9 = vsel %vm413_vm1, %v412_v7, 0.0  ;;  %s406_s15 = scalar_lea.vmem %s1279_s4, %s706_s30  ;;  %p917_p13 = scmp.ne.s32.totalorder %s1230_s20, %s916_s26 }
  0x68   : > { %415 = vadd.xlane.f32.xlu0 %v414_v9  ;;  %s1014_s21 = smov [#allocation10]  }
  0x69   : > { %p918_p2 = pnand %p917_p13, %p1100_p9  ;;  %s920_s11 = sshll.u32 %s1014_s21, 4  ;;  %s921_s11 = int_to_ptr.vmem [resolvable:$false] %s920_s11 }
  0x6a   : > { %719 = vmatmul.mubr.msk.bf16.vlgmr.msra.gmra.mxu0 %vm413_vm1, %v419_v8  ;;  %s922_s12 = scalar_lea.vmem %s921_s11, 256  ;;  %p923_p7 = scmp.lt.s32.totalorder %s1230_s20, %s921_s11 }
  0x6b   : > { %p919_p3 = pneg %p918_p2  ;;  %p924_p10 = scmp.lt.s32.totalorder %s922_s12, %s916_s26 }
  0x6d   : > { %p925_p12 = por %p924_p10, %p923_p7 }
  0x6f   : > { %p926_p4 = pnand %p925_p12, %p919_p3 }
  0xf1   : > { %v416_v10 = vpop.xlane.xlu0 %415 }
  0xf2   : > { %418 = vst.msk [vmem:[%s406_s15] sm:$0xff] %vm417_vm2, %v416_v10 }
 0x12a   : > { %v467_v11 = vpop.f32.mrf.mxu0 }
 0x12b   : > { %474 = vst.msk [vmem:[%s398_s14] sm:$0xff] %vm473_vm3, %v467_v11 }
 0x12c   : > { %v720_v12 = vpop.f32.mrf.mxu0 }
 0x12d   : > { %929 = shalt.err (!%p926_p4)
}
 0x12e   : > { %s930_s13 = scalar_lea.hbm %s1228_s10, 128  ;;  %s934_s17 = scalar_lea.hbm %s1280_s5, 512 }
 0x12f   : > { %p931_p0 = scmp.ne.s32.totalorder %s1228_s10, %s930_s13  ;;  %p935_p6 = scmp.lt.s32.totalorder %s1228_s10, %s1280_s5 }
 0x130   : > { %p936_p8 = scmp.lt.s32.totalorder %s934_s17, %s930_s13 }
 0x131   : > { %p932_p1 = pnand %p931_p0, %p1100_p9 }
 0x132   : > { %p937_p13 = por %p936_p8, %p935_p6 }
 0x133   : > { %p933_p5 = pneg %p932_p1 }
 0x135   : > { %p938_p2 = pnand %p937_p13, %p933_p5 }
 0x137   : > { %941 = shalt.err (!%p938_p2)
}
 0x138   : > { %730 = dma.vmem_to_hbm [thread:$0]  (%p1100_p9), %s1230_s20, 128, %s1228_s10, %s483_s27   ;;  %v470_v13 = vpop.f32.mrf.mxu0 }
 0x13a   : > { %v721_v14 = vpop.f32.mrf.mxu0 }
 0x13b PF: > { %p750_p3 = scmp.ge.s32.totalorder %s1004_s23, 2  ;;  %s523_s30 = sand.u32 1, %s984_s18  }
 0x13c   : > { %s524_s25 = scalar_lea.sflag [#allocation4], %s523_s30 }
 0x13d   : > { %p746_p7 = pnand %p750_p3, %p1107_p11 }
 0x13f   : > { %p747_p10 = pneg %p746_p7 }
 0x141   : > { %979 = dma.done.wait (%p747_p10), %s524_s25, 128  }
 0x142   : > { %981 = vsyncadd (%p747_p10), %s524_s25, 4294967168  ;;  %s28_s23 = sadd.s32 1, %s1004_s23   ;;  %s1299_s6 = sld [smem:[#allocation15_spill]] }
 0x143   : > { %p25_p12 = scmp.ge.s32.totalorder %s28_s23, 6   ;;  %s1300_s20 = sld [smem:[#allocation18_spill]] }
 0x144   : > { %s1301_s21 = sld [smem:[#allocation16_spill]]  ;;  %s1303_s18 = smov %s988_s19 }
 0x145   : > { %s1302_s22 = sld [smem:[#allocation17_spill]]  ;;  %27 = sbr.rel (!%p25_p12) target bundleno = 12 (0xc), region = 130 }
 0x148   : > { %s1304_s19 = smov %s1299_s6 }
 0x14a   :  { %529 = vsyncpa [#allocation3], 1 }
 0x14b   :  { %531 = vsyncpa [#allocation3 + $0x1], 1 }
 0x14c   :  { %532 = vsyncpa [#allocation6], 1 }
 0x14d   :  { %534 = vsyncpa [#allocation6 + $0x1], 1 }
 0x14e   :  { %535 = vsyncpa [#allocation9], 1 }
 0x14f   :  { %537 = vsyncpa [#allocation9 + $0x1], 1 }
 0x150   :  { %538 = vsyncpa [#allocation4], 1 }
 0x151   :  { %540 = vsyncpa [#allocation4 + $0x1], 1 }

</bundles_post_ra>
